<compile_context>
chip_gen: v7x
topology: tpu7x:2x2x1
jax: 0.10.0
libtpu: 0.0.40
codegen_flags: <defaults>
</compile_context>

<pallas_src>
import functools
import math

import jax
import jax.numpy as jnp
from jax.experimental import pallas as pl
from jax.experimental.pallas import tpu as pltpu

FC1_DIMS = 128
FC2_DIMS = 128
LANE = 128        # TPU lane width: last-dim multiples of 128 -> unmasked stores
SUBLANE = 8       # f32 sublane
MAX_TILE_B = 1024  # rows per grid step before we start tiling the batch


def _round_up(n, m):
    return ((n + m - 1) // m) * m


def _make_mlp_kernel(obs_dim, use_bf16):
    """Fused 3-layer MLP kernel; obs_dim / use_bf16 are static Python values."""

    def mlp_kernel(x_ref, w1_ref, w23_ref, b_ref, o_ref):
        x = x_ref[...]              # (tile_b, obs_dim)
        w1 = w1_ref[...]            # (obs_dim, FC1_DIMS)
        b1 = b_ref[0:1, :]          # rows of the fused (3, 128) bias block
        b2 = b_ref[1:2, :]
        b3 = b_ref[2:3, :]

        # ---- layer 1 -------------------------------------------------------
        if obs_dim <= SUBLANE:
            # K=2: an MXU matmul would push >98% zeros through the systolic
            # array; do broadcasted VPU FMAs instead (kept f32 on all chips).
            h1 = b1 + x[:, 0:1] * w1[0:1, :]
            for k in range(1, obs_dim):
                h1 = h1 + x[:, k:k + 1] * w1[k:k + 1, :]
        else:
            h1 = jnp.dot(x, w1, preferred_element_type=jnp.float32) + b1
        h1 = jnp.maximum(h1, 0.0)

        # ---- layers 2 & 3: fused weight slab, 128-lane-aligned static slices
        w23 = w23_ref[...]          # (FC1_DIMS, FC2_DIMS + A_pad)
        w2 = w23[:, :FC2_DIMS]
        w3 = w23[:, FC2_DIMS:]
        if use_bf16:
            # bf16 operands, f32 accumulation (MXU-native on v5e/v6e/v7x);
            # bias adds and ReLU stay f32 so v5e's VPU never touches bf16.
            h2 = jnp.dot(h1.astype(jnp.bfloat16), w2.astype(jnp.bfloat16),
                         preferred_element_type=jnp.float32) + b2
            h2 = jnp.maximum(h2, 0.0)
            out = jnp.dot(h2.astype(jnp.bfloat16), w3.astype(jnp.bfloat16),
                          preferred_element_type=jnp.float32) + b3
        else:
            h2 = jnp.dot(h1, w2, preferred_element_type=jnp.float32) + b2
            h2 = jnp.maximum(h2, 0.0)
            out = jnp.dot(h2, w3, preferred_element_type=jnp.float32) + b3

        # Lane-dense (tile_b, 128) output -> unmasked vector stores.
        o_ref[...] = out.astype(o_ref.dtype)

    return mlp_kernel


@functools.partial(jax.jit, static_argnames=("n_actions", "use_bf16"))
def network_forward(x, params, n_actions, use_bf16=False):
    """x: (B, obs_dim) float32. params: fused dict from init_params.

    Returns (B, n_actions) float32.
    """
    w1, w23, biases = params["w1"], params["w23"], params["biases"]
    B, obs_dim = x.shape
    A_pad = w23.shape[1] - FC2_DIMS       # lane-padded action width (128)

    # Grid collapse: whole footprint is <1 MB, so a single grid step covers
    # any typical batch. Only tile when B exceeds MAX_TILE_B. Small batches
    # pad only to the f32 sublane (8 rows), not 128.
    if B <= MAX_TILE_B:
        B_pad = _round_up(max(B, SUBLANE), SUBLANE)
        tile_b = B_pad
    else:
        tile_b = MAX_TILE_B
        B_pad = _round_up(B, tile_b)
    grid_steps = B_pad // tile_b

    if B_pad != B:
        x = jnp.pad(x, ((0, B_pad - B), (0, 0)))

    rep = lambda arr: pl.BlockSpec(arr.shape, lambda i: (0, 0))  # replicated operand

    out = pl.pallas_call(
        _make_mlp_kernel(obs_dim, use_bf16),
        out_shape=jax.ShapeDtypeStruct((B_pad, A_pad), jnp.float32),
        grid=(grid_steps,),
        in_specs=[
            pl.BlockSpec((tile_b, obs_dim), lambda i: (i, 0)),   # activations, batch-tiled
            rep(w1), rep(w23), rep(biases),                      # weights, fetched once
        ],
        out_specs=pl.BlockSpec((tile_b, A_pad), lambda i: (i, 0)),
        compiler_params=pltpu.CompilerParams(
            # Only shard across v7x's 2 TCs when there are >= 2 batch tiles
            # (B > MAX_TILE_B); a sub-microsecond single-tile call shouldn't
            # pay the per-TC prologue twice. No-op on v5e/v6e (1 TC).
            dimension_semantics=("parallel",) if grid_steps > 1 else ("arbitrary",)),
    )(x, w1, w23, biases)

    return out[:B, :n_actions]


def init_params(key, obs_dim, n_actions):
    """torch.nn.Linear-style init U(-1/sqrt(fan_in), +1/sqrt(fan_in)); operands are
    lane-padded and fused ONCE here (not per forward call)."""
    keys = jax.random.split(key, 6)

    def linear(kw, kb, fan_in, fan_out):
        bound = 1.0 / math.sqrt(fan_in)
        w = jax.random.uniform(kw, (fan_in, fan_out), jnp.float32, -bound, bound)
        b = jax.random.uniform(kb, (fan_out,), jnp.float32, -bound, bound)
        return w, b

    w1, b1 = linear(keys[0], keys[1], obs_dim, FC1_DIMS)
    w2, b2 = linear(keys[2], keys[3], FC1_DIMS, FC2_DIMS)
    w3, b3 = linear(keys[4], keys[5], FC2_DIMS, n_actions)

    # Lane-pad the output layer (n_actions -> 128) and fuse operands:
    #   w23    = [w2 | w3_pad]   -> (FC1_DIMS, FC2_DIMS + A_pad)
    #   biases = [b1; b2; b3_pad] -> (3, 128)
    A_pad = _round_up(max(n_actions, LANE), LANE)
    assert FC1_DIMS == FC2_DIMS == A_pad, "fused bias block assumes equal layer widths"
    w3p = jnp.pad(w3, ((0, 0), (0, A_pad - n_actions)))
    b3p = jnp.pad(b3, ((0, A_pad - n_actions),))
    w23 = jnp.concatenate([w2, w3p], axis=1)
    biases = jnp.stack([b1, b2, b3p], axis=0)
    return {"w1": w1, "w23": w23, "biases": biases}


def reference_forward(x, p, n_actions):
    w2 = p["w23"][:, :FC2_DIMS]
    w3 = p["w23"][:, FC2_DIMS:FC2_DIMS + n_actions]
    b1, b2 = p["biases"][0], p["biases"][1]
    b3 = p["biases"][2, :n_actions]
    h1 = jnp.maximum(x @ p["w1"] + b1, 0.0)
    h2 = jnp.maximum(h1 @ w2 + b2, 0.0)
    return h2 @ w3 + b3


if __name__ == "__main__":
    # SimpleDrivingEnv-like shapes: obs_dim=2, 9 discrete actions.
    OBS_DIM = 2
    N_ACTIONS = 9
    BATCH = 256   # DQN minibatch / vectorized envs; runs as a single grid step now.

    key = jax.random.PRNGKey(0)
    k_params, k_x = jax.random.split(key)
    params = init_params(k_params, OBS_DIM, N_ACTIONS)
    x = jax.random.normal(k_x, (BATCH, OBS_DIM), jnp.float32)

    out = jax.block_until_ready(network_forward(x, params, N_ACTIONS))
    ref = reference_forward(x, params, N_ACTIONS)
    assert out.shape == (BATCH, N_ACTIONS), out.shape
    assert jnp.allclose(out, ref, atol=1e-4, rtol=1e-4), "mismatch vs reference"

    # Small / odd batch exercises the sublane-padding path (B=3 -> B_pad=8).
    x_small = x[:3]
    out_small = jax.block_until_ready(network_forward(x_small, params, N_ACTIONS))
    assert out_small.shape == (3, N_ACTIONS)
    assert jnp.allclose(out_small, ref[:3], atol=1e-4, rtol=1e-4), "mismatch (padded batch)"

    print("KERNEL_OK")
</pallas_src>

<mosaic_0001>
module attributes {stable_mosaic.version = 11 : i64} {
  func.func @mlp_kernel(%arg0: i32, %arg1: memref<256x2xf32, #tpu.memory_space<vmem>>, %arg2: memref<2x128xf32, #tpu.memory_space<vmem>>, %arg3: memref<128x256xf32, #tpu.memory_space<vmem>>, %arg4: memref<3x128xf32, #tpu.memory_space<vmem>>, %arg5: memref<256x128xf32, #tpu.memory_space<vmem>>) attributes {dimension_semantics = [#tpu.dimension_semantics<arbitrary>], iteration_bounds = array<i64: 1>, scalar_prefetch = 0 : i64, scratch_operands = 0 : i64, tpu.core_type = #tpu.core_type<tc>, window_params = [{transform_indices = @transform_0, window_bounds = array<i64: 256, 2>}, {pipeline_mode = #tpu.pipeline_mode<synchronous>, transform_indices = @transform_1, window_bounds = array<i64: 2, 128>}, {pipeline_mode = #tpu.pipeline_mode<synchronous>, transform_indices = @transform_2, window_bounds = array<i64: 128, 256>}, {pipeline_mode = #tpu.pipeline_mode<synchronous>, transform_indices = @transform_3, window_bounds = array<i64: 3, 128>}, {transform_indices = @transform_4, window_bounds = array<i64: 256, 128>}]} {
    %c0 = arith.constant 0 : index
    %c0_0 = arith.constant 0 : index
    %0 = vector.load %arg1[%c0, %c0_0] : memref<256x2xf32, #tpu.memory_space<vmem>>, vector<256x2xf32>
    %c0_1 = arith.constant 0 : index
    %c0_2 = arith.constant 0 : index
    %1 = vector.load %arg2[%c0_1, %c0_2] : memref<2x128xf32, #tpu.memory_space<vmem>>, vector<2x128xf32>
    %c0_3 = arith.constant 0 : index
    %c0_4 = arith.constant 0 : index
    %2 = vector.load %arg4[%c0_3, %c0_4] : memref<3x128xf32, #tpu.memory_space<vmem>>, vector<1x128xf32>
    %c1 = arith.constant 1 : index
    %c0_5 = arith.constant 0 : index
    %3 = vector.load %arg4[%c1, %c0_5] : memref<3x128xf32, #tpu.memory_space<vmem>>, vector<1x128xf32>
    %c2 = arith.constant 2 : index
    %c0_6 = arith.constant 0 : index
    %4 = vector.load %arg4[%c2, %c0_6] : memref<3x128xf32, #tpu.memory_space<vmem>>, vector<1x128xf32>
    %5 = vector.extract_strided_slice %0 {offsets = [0, 0], sizes = [256, 1], strides = [1, 1]} : vector<256x2xf32> to vector<256x1xf32>
    %6 = vector.extract_strided_slice %1 {offsets = [0, 0], sizes = [1, 128], strides = [1, 1]} : vector<2x128xf32> to vector<1x128xf32>
    %7 = vector.broadcast %5 : vector<256x1xf32> to vector<256x128xf32>
    %8 = vector.broadcast %6 : vector<1x128xf32> to vector<256x128xf32>
    %9 = arith.mulf %7, %8 : vector<256x128xf32>
    %10 = vector.broadcast %2 : vector<1x128xf32> to vector<256x128xf32>
    %11 = arith.addf %10, %9 : vector<256x128xf32>
    %12 = vector.extract_strided_slice %0 {offsets = [0, 1], sizes = [256, 1], strides = [1, 1]} : vector<256x2xf32> to vector<256x1xf32>
    %13 = vector.extract_strided_slice %1 {offsets = [1, 0], sizes = [1, 128], strides = [1, 1]} : vector<2x128xf32> to vector<1x128xf32>
    %14 = vector.broadcast %12 : vector<256x1xf32> to vector<256x128xf32>
    %15 = vector.broadcast %13 : vector<1x128xf32> to vector<256x128xf32>
    %16 = arith.mulf %14, %15 : vector<256x128xf32>
    %17 = arith.addf %11, %16 : vector<256x128xf32>
    %cst = arith.constant 0.000000e+00 : f32
    %18 = vector.broadcast %cst : f32 to vector<256x128xf32>
    %19 = arith.maximumf %17, %18 : vector<256x128xf32>
    %c0_7 = arith.constant 0 : index
    %c0_8 = arith.constant 0 : index
    %20 = vector.load %arg3[%c0_7, %c0_8] : memref<128x256xf32, #tpu.memory_space<vmem>>, vector<128x256xf32>
    %21 = vector.extract_strided_slice %20 {offsets = [0, 0], sizes = [128, 128], strides = [1, 1]} : vector<128x256xf32> to vector<128x128xf32>
    %22 = vector.extract_strided_slice %20 {offsets = [0, 128], sizes = [128, 128], strides = [1, 1]} : vector<128x256xf32> to vector<128x128xf32>
    %cst_9 = arith.constant dense<0.000000e+00> : vector<256x128xf32>
    %23 = tpu.matmul %19, %21, %cst_9 {dimension_numbers = #tpu.dot_dimension_numbers<[1], [0], [0], [1], [0, 0, 1, 1], [], []>} : vector<256x128xf32>, vector<128x128xf32>, vector<256x128xf32> -> vector<256x128xf32>
    %24 = vector.broadcast %3 : vector<1x128xf32> to vector<256x128xf32>
    %25 = arith.addf %23, %24 : vector<256x128xf32>
    %cst_10 = arith.constant 0.000000e+00 : f32
    %26 = vector.broadcast %cst_10 : f32 to vector<256x128xf32>
    %27 = arith.maximumf %25, %26 : vector<256x128xf32>
    %cst_11 = arith.constant dense<0.000000e+00> : vector<256x128xf32>
    %28 = tpu.matmul %27, %22, %cst_11 {dimension_numbers = #tpu.dot_dimension_numbers<[1], [0], [0], [1], [0, 0, 1, 1], [], []>} : vector<256x128xf32>, vector<128x128xf32>, vector<256x128xf32> -> vector<256x128xf32>
    %29 = vector.broadcast %4 : vector<1x128xf32> to vector<256x128xf32>
    %30 = arith.addf %28, %29 : vector<256x128xf32>
    %c0_12 = arith.constant 0 : index
    %c0_13 = arith.constant 0 : index
    %31 = vector.load %arg5[%c0_12, %c0_13] : memref<256x128xf32, #tpu.memory_space<vmem>>, vector<256x128xf32>
    tpu.vector_store %arg5[%c0_12, %c0_13], %30 {strides = array<i32>} : memref<256x128xf32, #tpu.memory_space<vmem>>, vector<256x128xf32>,
    return
  }
  func.func @transform_0(%arg0: i32) -> (i32, i32) {
    %c0_i32 = arith.constant 0 : i32
    %c0_i32_0 = arith.constant 0 : i32
    return %arg0, %c0_i32 : i32, i32
  }
  func.func @transform_1(%arg0: i32) -> (i32, i32) {
    %c0_i32 = arith.constant 0 : i32
    %c0_i32_0 = arith.constant 0 : i32
    %c0_i32_1 = arith.constant 0 : i32
    return %c0_i32, %c0_i32_0 : i32, i32
  }
  func.func @transform_2(%arg0: i32) -> (i32, i32) {
    %c0_i32 = arith.constant 0 : i32
    %c0_i32_0 = arith.constant 0 : i32
    %c0_i32_1 = arith.constant 0 : i32
    return %c0_i32, %c0_i32_0 : i32, i32
  }
  func.func @transform_3(%arg0: i32) -> (i32, i32) {
    %c0_i32 = arith.constant 0 : i32
    %c0_i32_0 = arith.constant 0 : i32
    %c0_i32_1 = arith.constant 0 : i32
    return %c0_i32, %c0_i32_0 : i32, i32
  }
  func.func @transform_4(%arg0: i32) -> (i32, i32) {
    %c0_i32 = arith.constant 0 : i32
    %c0_i32_0 = arith.constant 0 : i32
    return %arg0, %c0_i32 : i32, i32
  }
}

</mosaic_0001>

<bundles_post_ra>
// kernel: network_forward.1
= control target key start
LH: loop header
LB: loop body
LE: loop exit
PB: predicated region body
PF: predicated region fallthrough
CT: control target
= control target key end

     0   :  { %v1430_v0 = vmov 1   ;;  %v1431_v7 = vmov 0   ;;  %v213_v63 = vlaneseq  ;;  %s2011_s0 = inlined_call_operand.vmem [shape: f32[256,2], index: 0, kind: input, shape index: {}]   ;;  %s2012_s2 = inlined_call_operand.vmem [shape: f32[128,256], index: 2, kind: input, shape index: {}]   ;;  %s2013_s1 = inlined_call_operand.vmem [shape: f32[2,128], index: 1, kind: input, shape index: {}]   ;;  %s2014_s3 = inlined_call_operand.vmem [shape: f32[3,128], index: 3, kind: input, shape index: {}]   ;;  %s2015_s4 = inlined_call_operand.vmem [shape: f32[256,128], index: 4, kind: output, shape index: {}]  }
   0x1   :  { %1398 = vset.pattern.permute.xlu0 %v1430_v0  ;;  %1396 = vset.pattern.permute.xlu1 %v1430_v0  ;;  %v1462_v1 = vld [vmem:[%s2011_s0 + $0x10] sm:$0xff]  ;;  %v17_v2 = vld [vmem:[%s2011_s0] sm:$0xff]  ;;  %v18_v4 = vld [vmem:[%s2011_s0 + $0x8] sm:$0xff] }
   0x2   :  { %294 = vperm.xlu0 %1398, %v1462_v1   ;;  %286 = vperm.xlu1 %1396, %v17_v2   ;;  %v1471_v3 = vld [vmem:[%s2011_s0 + $0x30] sm:$0xff]  ;;  %v20_v6 = vld [vmem:[%s2011_s0 + $0x18] sm:$0xff]  ;;  %v513_v8 = vld [vmem:[%s2012_s2] sm:$0xff] }
   0x3   :  { %v1480_v5 = vld [vmem:[%s2011_s0 + $0x50] sm:$0xff]  ;;  %v517_v12 = vld [vmem:[%s2012_s2 + $0x20] sm:$0xff]  ;;  %v22_v28 = vld [vmem:[%s2011_s0 + $0x28] sm:$0xff] }
   0x4   :  { %v1493_v9 = vld [vmem:[%s2011_s0 + $0x70] sm:$0xff]  ;;  %v521_v16 = vld [vmem:[%s2012_s2 + $0x40] sm:$0xff]  ;;  %v24_v32 = vld [vmem:[%s2011_s0 + $0x38] sm:$0xff] }
   0x5   :  { %v515_v10 = vld [vmem:[%s2012_s2 + $0x10] sm:$0xff]  ;;  %v21_v19 = vld [vmem:[%s2011_s0 + $0x20] sm:$0xff]  ;;  %v26_v40 = vld [vmem:[%s2011_s0 + $0x48] sm:$0xff] }
   0x6   :  { %310 = vperm.xlu0 %1398, %v1471_v3   ;;  %290 = vperm.xlu1 %1396, %v18_v4   ;;  %v1330_v11 = vpack.c.bf16 %v515_v10, %v513_v8  ;;  %v519_v13 = vld [vmem:[%s2012_s2 + $0x30] sm:$0xff]  ;;  %v525_v21 = vld [vmem:[%s2012_s2 + $0x60] sm:$0xff]  ;;  %v30_v41 = vld [vmem:[%s2011_s0 + $0x68] sm:$0xff] }
   0x7   :  { %v1334_v14 = vpack.c.bf16 %v519_v13, %v517_v12  ;;  %v1509_v15 = vld [vmem:[%s2011_s0 + $0x90] sm:$0xff]  ;;  %v529_v25 = vld [vmem:[%s2012_s2 + $0x80] sm:$0xff]  ;;  %v28_v42 = vld [vmem:[%s2011_s0 + $0x58] sm:$0xff] }
   0x8   :  { %1331 = vmatprep.subr.bf16.mxu0 %v1330_v11  ;;  %v523_v17 = vld [vmem:[%s2012_s2 + $0x50] sm:$0xff]  ;;  %v533_v29 = vld [vmem:[%s2012_s2 + $0xa0] sm:$0xff]  ;;  %v34_v43 = vld [vmem:[%s2011_s0 + $0x88] sm:$0xff] }
   0x9   :  { %1333 = vmatpush3.bf16.msra.mxu0 %v1330_v11  ;;  %v1338_v18 = vpack.c.bf16 %v523_v17, %v521_v16  ;;  %v1524_v20 = vld [vmem:[%s2011_s0 + $0xb0] sm:$0xff]  ;;  %v537_v33 = vld [vmem:[%s2012_s2 + $0xc0] sm:$0xff]  ;;  %v38_v45 = vld [vmem:[%s2011_s0 + $0xa8] sm:$0xff] }
   0xa   :  { %326 = vperm.xlu0 %1398, %v1480_v5   ;;  %1397 = vset.pattern.permute.xlu1 %v1431_v7  ;;  %v527_v22 = vld [vmem:[%s2012_s2 + $0x70] sm:$0xff]  ;;  %v541_v36 = vld [vmem:[%s2012_s2 + $0xe0] sm:$0xff]  ;;  %v42_v46 = vld [vmem:[%s2011_s0 + $0xc8] sm:$0xff] }
   0xb   :  { %70 = vperm.xlu1 %1397, %v20_v6   ;;  %1335 = vmatprep.subr.bf16.mxu0 %v1334_v14  ;;  %v1342_v23 = vpack.c.bf16 %v527_v22, %v525_v21  ;;  %v1537_v24 = vld [vmem:[%s2011_s0 + $0xd0] sm:$0xff]  ;;  %v25_v39 = vld [vmem:[%s2011_s0 + $0x40] sm:$0xff]  ;;  %v32_v47 = vld [vmem:[%s2011_s0 + $0x78] sm:$0xff] }
   0xc   :  { %v531_v26 = vld [vmem:[%s2012_s2 + $0x90] sm:$0xff]  ;;  %v29_v44 = vld [vmem:[%s2011_s0 + $0x60] sm:$0xff]  ;;  %v1619_v48 = vld [vmem:[%s2011_s0 + $0xe8] sm:$0xff] }
   0xd   :  { %1337 = vmatpush3.bf16.msra.mxu0 %v1334_v14  ;;  %v1346_v27 = vpack.c.bf16 %v531_v26, %v529_v25  ;;  %v535_v30 = vld [vmem:[%s2012_s2 + $0xb0] sm:$0xff]  ;;  %v33_v49 = vld [vmem:[%s2011_s0 + $0x80] sm:$0xff]  ;;  %v36_v51 = vld [vmem:[%s2011_s0 + $0x98] sm:$0xff] }
   0xe   :  { %342 = vperm.xlu0 %1398, %v1493_v9   ;;  %1339 = vmatprep.subr.bf16.mxu0 %v1338_v18  ;;  %v1350_v31 = vpack.c.bf16 %v535_v30, %v533_v29  ;;  %v539_v34 = vld [vmem:[%s2012_s2 + $0xd0] sm:$0xff]  ;;  %v37_v52 = vld [vmem:[%s2011_s0 + $0xa0] sm:$0xff]  ;;  %v40_v53 = vld [vmem:[%s2011_s0 + $0xb8] sm:$0xff] }
   0xf   :  { %1399 = vset.pattern.permute.xlu1 %v1430_v0  ;;  %v1354_v35 = vpack.c.bf16 %v539_v34, %v537_v33  ;;  %v543_v37 = vld [vmem:[%s2012_s2 + $0xf0] sm:$0xff]  ;;  %v41_v60 = vld [vmem:[%s2011_s0 + $0xc0] sm:$0xff] }
  0x10   :  { %298 = vperm.xlu1 %1399, %v20_v6   ;;  %v1358_v38 = vpack.c.bf16 %v543_v37, %v541_v36  ;;  %v47_v50 = vld [vmem:[%s2011_s0 + $0xf0] sm:$0xff]  ;;  %v49_v11 = vld [vmem:[%s2013_s1] sm:$0x3] }
  0x11   :  { %1341 = vmatpush3.bf16.msra.mxu0 %v1338_v18  ;;  %v1679_v17 = vld [vmem:[%s2014_s3] ss:$0 sm:$0xff] }
  0x12   :  { %358 = vperm.xlu0 %1398, %v1509_v15   ;;  %1343 = vmatprep.subr.bf16.mxu0 %v1342_v23  ;;  %v45_v22 = vld [vmem:[%s2011_s0 + $0xe0] sm:$0xff] }
  0x14   :  { %1400 = vset.pattern.permute.xlu1 %v1431_v7 }
  0x15   :  { %75 = vperm.xlu1 %1400, %v21_v19   ;;  %1345 = vmatpush3.bf16.msra.mxu0 %v1342_v23 }
  0x16   :  { %374 = vperm.xlu0 %1398, %v1524_v20   ;;  %1347 = vmatprep.subr.bf16.mxu0 %v1346_v27 }
  0x19   :  { %1401 = vset.pattern.permute.xlu1 %v1430_v0  ;;  %1349 = vmatpush3.bf16.msra.mxu0 %v1346_v27 }
  0x1a   :  { %390 = vperm.xlu0 %1398, %v1537_v24   ;;  %302 = vperm.xlu1 %1401, %v21_v19  }
  0x1b   :  { %1351 = vmatprep.subr.bf16.mxu0 %v1350_v31 }
  0x1d   :  { %1353 = vmatpush3.bf16.msra.mxu0 %v1350_v31 }
  0x1e   :  { %1423 = vset.pattern.permute.xlu0 %v1431_v7  ;;  %306 = vperm.xlu1 %1401, %v22_v28  }
  0x1f   :  { %55 = vperm.xlu0 %1423, %v17_v2   ;;  %1355 = vmatprep.subr.bf16.mxu0 %v1354_v35 }
  0x21   :  { %1357 = vmatpush3.bf16.msra.mxu0 %v1354_v35 }
  0x22   :  { %1402 = vset.pattern.permute.xlu1 %v1431_v7  ;;  %1359 = vmatprep.subr.bf16.mxu0 %v1358_v38 }
  0x23   :  { %60 = vperm.xlu0 %1423, %v18_v4   ;;  %90 = vperm.xlu1 %1402, %v24_v32  }
  0x25   :  { %1361 = vmatpush3.bf16.msra.mxu0 %v1358_v38 }
  0x27   :  { %65 = vperm.xlu0 %1423, %v1462_v1   ;;  %1403 = vset.pattern.permute.xlu1 %v1430_v0 }
  0x28   :  { %314 = vperm.xlu1 %1403, %v24_v32  }
  0x2b   :  { %80 = vperm.xlu0 %1423, %v22_v28  }
  0x2c   :  { %1404 = vset.pattern.permute.xlu1 %v1431_v7 }
  0x2d   :  { %95 = vperm.xlu1 %1404, %v25_v39  }
  0x2f   :  { %85 = vperm.xlu0 %1423, %v1471_v3   ;;  %v214_v3 = vshrl.u32 %v213_v63, 7 }
  0x31   :  { %1405 = vset.pattern.permute.xlu1 %v1430_v0  ;;  %v415_v6 = vsub.s32 1, %v214_v3  ;;  %v215_v8 = vsub.s32 0, %v214_v3 }
  0x32   :  { %318 = vperm.xlu1 %1405, %v25_v39  }
  0x33   :  { %100 = vperm.xlu0 %1423, %v26_v40   ;;  %v1670_v12 = vrot.slane %v49_v11, %v415_v6  ;;  %v1672_v13 = vrot.slane %v49_v11, %v215_v8 }
  0x36   :  { %322 = vperm.xlu1 %1405, %v26_v40  }
  0x37   :  { %105 = vperm.xlu0 %1423, %v1480_v5   ;;  %v44_v5 = vld [vmem:[%s2011_s0 + $0xd8] sm:$0xff] }
  0x3a   :  { %1406 = vset.pattern.permute.xlu1 %v1431_v7 }
  0x3b   :  { %120 = vperm.xlu0 %1423, %v30_v41   ;;  %110 = vperm.xlu1 %1406, %v28_v42  }
  0x3f   :  { %125 = vperm.xlu0 %1423, %v1493_v9   ;;  %1407 = vset.pattern.permute.xlu1 %v1430_v0 }
  0x40   :  { %330 = vperm.xlu1 %1407, %v28_v42  }
  0x43   :  { %140 = vperm.xlu0 %1423, %v34_v43  }
  0x44   :  { %1408 = vset.pattern.permute.xlu1 %v1431_v7 }
  0x45   :  { %115 = vperm.xlu1 %1408, %v29_v44  }
  0x47   :  { %145 = vperm.xlu0 %1423, %v1509_v15  }
  0x49   :  { %1409 = vset.pattern.permute.xlu1 %v1430_v0 }
  0x4a   :  { %334 = vperm.xlu1 %1409, %v29_v44  }
  0x4b   :  { %160 = vperm.xlu0 %1423, %v38_v45  }
  0x4e   :  { %338 = vperm.xlu1 %1409, %v30_v41  }
  0x4f   :  { %165 = vperm.xlu0 %1423, %v1524_v20  }
  0x52   :  { %1410 = vset.pattern.permute.xlu1 %v1431_v7 }
  0x53   :  { %180 = vperm.xlu0 %1423, %v42_v46   ;;  %130 = vperm.xlu1 %1410, %v32_v47  }
  0x57   :  { %185 = vperm.xlu0 %1423, %v1537_v24   ;;  %1411 = vset.pattern.permute.xlu1 %v1430_v0 }
  0x58   :  { %346 = vperm.xlu1 %1411, %v32_v47  }
  0x5b   :  { %200 = vperm.xlu0 %1423, %v1619_v48  }
  0x5c   :  { %1412 = vset.pattern.permute.xlu1 %v1431_v7 }
  0x5d   :  { %135 = vperm.xlu1 %1412, %v33_v49  }
  0x5f   :  { %205 = vperm.xlu0 %1423, %v47_v50  }
  0x61   :  { %1413 = vset.pattern.permute.xlu1 %v1430_v0 }
  0x62   :  { %350 = vperm.xlu1 %1413, %v33_v49  }
  0x63   :  { %1428 = vset.pattern.permute.xlu0 %v1430_v0 }
  0x64   :  { %406 = vperm.xlu0 %1428, %v47_v50  }
  0x66   :  { %354 = vperm.xlu1 %1413, %v34_v43  }
  0x6a   :  { %1414 = vset.pattern.permute.xlu1 %v1431_v7 }
  0x6b   :  { %150 = vperm.xlu1 %1414, %v36_v51  }
  0x6f   :  { %1415 = vset.pattern.permute.xlu1 %v1430_v0 }
  0x70   :  { %362 = vperm.xlu1 %1415, %v36_v51  }
  0x74   :  { %1416 = vset.pattern.permute.xlu1 %v1431_v7 }
  0x75   :  { %155 = vperm.xlu1 %1416, %v37_v52  }
  0x79   :  { %1417 = vset.pattern.permute.xlu1 %v1430_v0 }
  0x7a   :  { %366 = vperm.xlu1 %1417, %v37_v52  }
  0x7e   :  { %370 = vperm.xlu1 %1417, %v38_v45  }
  0x81   :  { %v287_v54 = vpop.permute.xlu1 %286  ;;  %v295_v55 = vpop.permute.xlu0 %294 }
  0x82   :  { %1418 = vset.pattern.permute.xlu1 %v1431_v7  ;;  %v417_v18 = vmul.f32 %v1670_v12, %v287_v54  ;;  %v419_v32 = vmul.f32 %v1670_v12, %v295_v55 }
  0x83   :  { %170 = vperm.xlu1 %1418, %v40_v53  }
  0x85   :  { %v291_v56 = vpop.permute.xlu1 %290  ;;  %v1645_v57 = vpop.permute.xlu0 %310 }
  0x86   :  { %v418_v26 = vmul.f32 %v1670_v12, %v291_v56  ;;  %v423_v56 = vmul.f32 %v1670_v12, %v1645_v57 }
  0x87   :  { %1419 = vset.pattern.permute.xlu1 %v1430_v0 }
  0x88   :  { %378 = vperm.xlu1 %1419, %v40_v53  }
  0x89   :  { %v1648_v58 = vpop.permute.xlu0 %326 }
  0x8a   :  { %v71_v59 = vpop.permute.xlu1 %70 }
  0x8b   :  { %v220_v25 = vmul.f32 %v1672_v13, %v71_v59 }
  0x8c   :  { %1420 = vset.pattern.permute.xlu1 %v1431_v7 }
  0x8d   :  { %175 = vperm.xlu1 %1420, %v41_v60   ;;  %v1654_v61 = vpop.permute.xlu0 %342  ;;  %v256_v37 = vadd.f32 %v1679_v17, %v220_v25 }
  0x8f   :  { %v299_v62 = vpop.permute.xlu1 %298 }
  0x90   :  { %v420_v30 = vmul.f32 %v1670_v12, %v299_v62 }
  0x91   :  { %1421 = vset.pattern.permute.xlu1 %v1430_v0  ;;  %v1657_v1 = vpop.permute.xlu0 %358 }
  0x92   :  { %382 = vperm.xlu1 %1421, %v41_v60   ;;  %v452_v41 = vadd.f32 %v420_v30, %v256_v37 }
  0x94   :  { %v76_v2 = vpop.permute.xlu1 %75  ;;  %v484_v52 = vmax.f32 %v452_v41, 0.0  ;;  %v524_v41 = vld [vmem:[%s2012_s2 + $0x58] sm:$0xff] }
  0x95   :  { %v1659_v4 = vpop.permute.xlu0 %374  ;;  %v221_v27 = vmul.f32 %v1672_v13, %v76_v2  ;;  %v48_v2 = vld [vmem:[%s2011_s0 + $0xf8] sm:$0xff] }
  0x96   :  { %386 = vperm.xlu1 %1421, %v42_v46  }
  0x97   :  { %v257_v38 = vadd.f32 %v1679_v17, %v221_v27 }
  0x99   :  { %v303_v9 = vpop.permute.xlu1 %302  ;;  %v1664_v10 = vpop.permute.xlu0 %390 }
  0x9a   :  { %1422 = vset.pattern.permute.xlu1 %v1431_v7  ;;  %v421_v33 = vmul.f32 %v1670_v12, %v303_v9 }
  0x9b   :  { %190 = vperm.xlu1 %1422, %v44_v5  }
  0x9c   :  { %v453_v43 = vadd.f32 %v421_v33, %v257_v38  ;;  %v518_v33 = vld [vmem:[%s2012_s2 + $0x28] sm:$0xff] }
  0x9d   :  { %v307_v14 = vpop.permute.xlu1 %306 }
  0x9e   :  { %v56_v15 = vpop.permute.xlu0 %55  ;;  %v422_v49 = vmul.f32 %v1670_v12, %v307_v14  ;;  %v485_v59 = vmax.f32 %v453_v43, 0.0 }
  0x9f   :  { %v217_v16 = vmul.f32 %v1672_v13, %v56_v15  ;;  %1424 = vset.pattern.permute.xlu1 %v1430_v0 }
  0xa0   :  { %394 = vperm.xlu1 %1424, %v44_v5  }
  0xa1   :  { %v253_v19 = vadd.f32 %v1679_v17, %v217_v16 }
  0xa2   :  { %v61_v20 = vpop.permute.xlu0 %60  ;;  %v91_v21 = vpop.permute.xlu1 %90 }
  0xa3   :  { %v218_v23 = vmul.f32 %v1672_v13, %v61_v20  ;;  %v449_v24 = vadd.f32 %v417_v18, %v253_v19  ;;  %v224_v46 = vmul.f32 %v1672_v13, %v91_v21 }
  0xa4   :  { %1425 = vset.pattern.permute.xlu1 %v1431_v7 }
  0xa5   :  { %v254_v28 = vadd.f32 %v1679_v17, %v218_v23  ;;  %195 = vperm.xlu1 %1425, %v45_v22   ;;  %v481_v29 = vmax.f32 %v449_v24, 0.0  ;;  %v260_v63 = vadd.f32 %v1679_v17, %v224_v46  ;;  %v427_v24 = vmul.f32 %v1670_v12, %v1648_v58  ;;  %v514_v58 = vld [vmem:[%s2012_s2 + $0x8] sm:$0xff] }
  0xa6   :  { %v66_v31 = vpop.permute.xlu0 %65 }
  0xa7   :  { %v219_v34 = vmul.f32 %v1672_v13, %v66_v31  ;;  %1202 = vmatprep.mubr.f32.mxu0 %v481_v29  ;;  %v315_v35 = vpop.permute.xlu1 %314  ;;  %v450_v36 = vadd.f32 %v418_v26, %v254_v28 }
  0xa8   :  { %v424_v53 = vmul.f32 %v1670_v12, %v315_v35 }
  0xa9   :  { %v255_v39 = vadd.f32 %v1679_v17, %v219_v34  ;;  %1426 = vset.pattern.permute.xlu1 %v1430_v0  ;;  %v482_v40 = vmax.f32 %v450_v36, 0.0  ;;  %v520_v36 = vld [vmem:[%s2012_s2 + $0x38] sm:$0xff] }
  0xaa   :  { %v81_v42 = vpop.permute.xlu0 %80  ;;  %398 = vperm.xlu1 %1426, %v45_v22   ;;  %v456_v6 = vadd.f32 %v424_v53, %v260_v63 }
  0xab   :  { %v222_v44 = vmul.f32 %v1672_v13, %v81_v42  ;;  %1203 = vmatmul.mubr.f32.vlgmr.msra.gmra.mrb[0].mxu0 %v482_v40  ;;  %v451_v45 = vadd.f32 %v419_v32, %v255_v39  ;;  %v1366_v39 = vpack.c.bf16 %v520_v36, %v518_v33  ;;  %v522_v40 = vld [vmem:[%s2012_s2 + $0x48] sm:$0xff] }
  0xac   :  { %v96_v47 = vpop.permute.xlu1 %95  ;;  %v488_v20 = vmax.f32 %v456_v6, 0.0  ;;  %v1370_v43 = vpack.c.bf16 %v524_v41, %v522_v40 }
  0xad   :  { %v258_v50 = vadd.f32 %v1679_v17, %v222_v44  ;;  %v483_v51 = vmax.f32 %v451_v45, 0.0  ;;  %v225_v54 = vmul.f32 %v1672_v13, %v96_v47  ;;  %v526_v47 = vld [vmem:[%s2012_s2 + $0x68] sm:$0xff] }
  0xae   :  { %v86_v55 = vpop.permute.xlu0 %85  ;;  %402 = vperm.xlu1 %1426, %v1619_v48  }
  0xaf   :  { %v223_v60 = vmul.f32 %v1672_v13, %v86_v55  ;;  %1205 = vmatprep.mubr.f32.mxu0 %v483_v51  ;;  %v454_v62 = vadd.f32 %v422_v49, %v258_v50  ;;  %v261_v57 = vadd.f32 %v1679_v17, %v225_v54  ;;  %v528_v49 = vld [vmem:[%s2012_s2 + $0x78] sm:$0xff]  ;;  %v530_v54 = vld [vmem:[%s2012_s2 + $0x88] sm:$0xff] }
  0xb0   :  { %1206 = vmatmul.mubr.f32.gmra.mrb[2].mxu0 %v484_v52  ;;  %v1374_v52 = vpack.c.bf16 %v528_v49, %v526_v47  ;;  %v532_v55 = vld [vmem:[%s2012_s2 + $0x98] sm:$0xff] }
  0xb1   :  { %v259_v3 = vadd.f32 %v1679_v17, %v223_v60  ;;  %1208 = vmatprep.mubr.f32.mxu0 %v485_v59  ;;  %v319_v5 = vpop.permute.xlu1 %318  ;;  %v486_v48 = vmax.f32 %v454_v62, 0.0 }
  0xb2   :  { %v425_v8 = vmul.f32 %v1670_v12, %v319_v5  ;;  %v101_v9 = vpop.permute.xlu0 %100  ;;  %1427 = vset.pattern.permute.xlu1 %v1431_v7 }
  0xb3   :  { %v226_v11 = vmul.f32 %v1672_v13, %v101_v9  ;;  %210 = vperm.xlu1 %1427, %v48_v2   ;;  %v455_v14 = vadd.f32 %v423_v56, %v259_v3  ;;  %v431_v56 = vmul.f32 %v1670_v12, %v1654_v61  ;;  %v536_v61 = vld [vmem:[%s2012_s2 + $0xb8] sm:$0xff] }
  0xb4   :  { %v457_v15 = vadd.f32 %v425_v8, %v261_v57  ;;  %1209 = vmatmul.mubr.f32.gmra.mrb[4].mxu0 %v486_v48  ;;  %v534_v48 = vld [vmem:[%s2012_s2 + $0xa8] sm:$0xff] }
  0xb5   :  { %v262_v16 = vadd.f32 %v1679_v17, %v226_v11  ;;  %v323_v18 = vpop.permute.xlu1 %322  ;;  %v487_v19 = vmax.f32 %v455_v14, 0.0  ;;  %v1382_v11 = vpack.c.bf16 %v536_v61, %v534_v48 }
  0xb6   :  { %v489_v21 = vmax.f32 %v457_v15, 0.0  ;;  %v426_v22 = vmul.f32 %v1670_v12, %v323_v18  ;;  %v106_v23 = vpop.permute.xlu0 %105  ;;  %v538_v15 = vld [vmem:[%s2012_s2 + $0xc8] sm:$0xff] }
  0xb7   :  { %v227_v7 = vmul.f32 %v1672_v13, %v106_v23  ;;  %1429 = vset.pattern.permute.xlu1 %v1430_v0  ;;  %1211 = vmatprep.mubr.f32.mxu0 %v487_v19  ;;  %v516_v0 = vld [vmem:[%s2012_s2 + $0x18] sm:$0xff] }
  0xb8   :  { %v458_v25 = vadd.f32 %v426_v22, %v262_v16  ;;  %410 = vperm.xlu1 %1429, %v48_v2   ;;  %1212 = vmatmul.mubr.f32.gmra.mrb[6].mxu0 %v488_v20  ;;  %v1362_v35 = vpack.c.bf16 %v516_v0, %v514_v58  ;;  %v1378_v2 = vpack.c.bf16 %v532_v55, %v530_v54  ;;  %v540_v16 = vld [vmem:[%s2012_s2 + $0xd8] sm:$0xff] }
  0xb9   :  { %v263_v26 = vadd.f32 %v1679_v17, %v227_v7  ;;  %1214 = vmatprep.mubr.f32.mxu0 %v489_v21  ;;  %v1386_v21 = vpack.c.bf16 %v540_v16, %v538_v15 }
  0xba   :  { %v490_v27 = vmax.f32 %v458_v25, 0.0  ;;  %v111_v28 = vpop.permute.xlu1 %110  ;;  %v121_v32 = vpop.permute.xlu0 %120  ;;  %1363 = vmatprep.subr.bf16.mxu1 %v1362_v35 }
  0xbb   :  { %v459_v29 = vadd.f32 %v427_v24, %v263_v26  ;;  %v228_v30 = vmul.f32 %v1672_v13, %v111_v28  ;;  %1365 = vmatpush3.bf16.msra.mxu1 %v1362_v35  ;;  %v230_v53 = vmul.f32 %v1672_v13, %v121_v32 }
  0xbc   :  { %1215 = vmatmul.mubr.f32.gmra.mrb[8].mxu0 %v490_v27  ;;  %1367 = vmatprep.subr.bf16.mxu1 %v1366_v39 }
  0xbd   :  { %v491_v31 = vmax.f32 %v459_v29, 0.0  ;;  %v264_v37 = vadd.f32 %v1679_v17, %v228_v30  ;;  %v266_v3 = vadd.f32 %v1679_v17, %v230_v53 }
  0xbe   :  { %v126_v44 = vpop.permute.xlu0 %125 }
  0xbf   :  { %v331_v34 = vpop.permute.xlu1 %330  ;;  %1217 = vmatprep.mubr.f32.mxu0 %v491_v31  ;;  %v231_v50 = vmul.f32 %v1672_v13, %v126_v44  ;;  %1369 = vmatpush3.bf16.msra.mxu1 %v1366_v39 }
  0xc0   :  { %v428_v38 = vmul.f32 %v1670_v12, %v331_v34  ;;  %1371 = vmatprep.subr.bf16.mxu1 %v1370_v43  ;;  %v435_v34 = vmul.f32 %v1670_v12, %v1657_v1 }
  0xc1   :  { %v267_v59 = vadd.f32 %v1679_v17, %v231_v50 }
  0xc2   :  { %v460_v42 = vadd.f32 %v428_v38, %v264_v37  ;;  %v141_v24 = vpop.permute.xlu0 %140 }
  0xc3   :  { %1373 = vmatpush3.bf16.msra.mxu1 %v1370_v43  ;;  %v463_v57 = vadd.f32 %v431_v56, %v267_v59  ;;  %v234_v32 = vmul.f32 %v1672_v13, %v141_v24 }
  0xc4   :  { %v492_v45 = vmax.f32 %v460_v42, 0.0  ;;  %v116_v46 = vpop.permute.xlu1 %115  ;;  %1375 = vmatprep.subr.bf16.mxu1 %v1374_v52 }
  0xc5   :  { %v229_v51 = vmul.f32 %v1672_v13, %v116_v46  ;;  %v495_v18 = vmax.f32 %v463_v57, 0.0  ;;  %v270_v36 = vadd.f32 %v1679_v17, %v234_v32 }
  0xc6   :  { %1218 = vmatmul.mubr.f32.gmra.mrb[10].mxu0 %v492_v45  ;;  %v146_v29 = vpop.permute.xlu0 %145 }
  0xc7   :  { %v265_v62 = vadd.f32 %v1679_v17, %v229_v51  ;;  %1377 = vmatpush3.bf16.msra.mxu1 %v1374_v52  ;;  %v235_v31 = vmul.f32 %v1672_v13, %v146_v29 }
  0xc8   :  { %1379 = vmatprep.subr.bf16.mxu1 %v1378_v2 }
  0xc9   :  { %v335_v60 = vpop.permute.xlu1 %334  ;;  %v271_v35 = vadd.f32 %v1679_v17, %v235_v31 }
  0xca   :  { %v429_v63 = vmul.f32 %v1670_v12, %v335_v60  ;;  %v161_v47 = vpop.permute.xlu0 %160 }
  0xcb   :  { %1381 = vmatpush3.bf16.msra.mxu1 %v1378_v2  ;;  %v467_v41 = vadd.f32 %v435_v34, %v271_v35  ;;  %v238_v60 = vmul.f32 %v1672_v13, %v161_v47  ;;  %v439_v2 = vmul.f32 %v1670_v12, %v1659_v4 }
  0xcc   :  { %v461_v5 = vadd.f32 %v429_v63, %v265_v62  ;;  %1383 = vmatprep.subr.bf16.mxu1 %v1382_v11 }
  0xcd   :  { %v339_v6 = vpop.permute.xlu1 %338  ;;  %v499_v45 = vmax.f32 %v467_v41, 0.0  ;;  %v274_v61 = vadd.f32 %v1679_v17, %v238_v60 }
  0xce   :  { %v493_v8 = vmax.f32 %v461_v5, 0.0  ;;  %v430_v9 = vmul.f32 %v1670_v12, %v339_v6  ;;  %v166_v54 = vpop.permute.xlu0 %165 }
  0xcf   :  { %1385 = vmatpush3.bf16.msra.mxu1 %v1382_v11  ;;  %v239_v56 = vmul.f32 %v1672_v13, %v166_v54 }
  0xd0   :  { %v462_v14 = vadd.f32 %v430_v9, %v266_v3  ;;  %1220 = vmatprep.mubr.f32.mxu0 %v493_v8  ;;  %1387 = vmatprep.subr.bf16.mxu1 %v1386_v21  ;;  %v542_v8 = vld [vmem:[%s2012_s2 + $0xe8] sm:$0xff]  ;;  %v544_v9 = vld [vmem:[%s2012_s2 + $0xf8] sm:$0xff] }
  0xd1   :  { %v275_v3 = vadd.f32 %v1679_v17, %v239_v56 }
  0xd2   :  { %v494_v19 = vmax.f32 %v462_v14, 0.0  ;;  %v131_v20 = vpop.permute.xlu1 %130  ;;  %v1390_v14 = vpack.c.bf16 %v544_v9, %v542_v8 }
  0xd3   :  { %v232_v22 = vmul.f32 %v1672_v13, %v131_v20  ;;  %1389 = vmatpush3.bf16.msra.mxu1 %v1386_v21  ;;  %v471_v11 = vadd.f32 %v439_v2, %v275_v3  ;;  %v181_v20 = vpop.permute.xlu0 %180 }
  0xd4   :  { %1221 = vmatmul.mubr.f32.gmra.mrb[12].mxu0 %v494_v19  ;;  %1391 = vmatprep.subr.bf16.mxu1 %v1390_v14 }
  0xd5   :  { %1223 = vmatprep.mubr.f32.mxu0 %v495_v18  ;;  %v268_v7 = vadd.f32 %v1679_v17, %v232_v22  ;;  %v503_v18 = vmax.f32 %v471_v11, 0.0 }
  0xd7   :  { %v347_v23 = vpop.permute.xlu1 %346  ;;  %1393 = vmatpush3.bf16.msra.mxu1 %v1390_v14 }
  0xd8   :  { %v432_v25 = vmul.f32 %v1670_v12, %v347_v23 }
  0xda   :  { %v464_v26 = vadd.f32 %v432_v25, %v268_v7  ;;  %v186_v7 = vpop.permute.xlu0 %185 }
  0xdc   :  { %v496_v27 = vmax.f32 %v464_v26, 0.0  ;;  %v136_v28 = vpop.permute.xlu1 %135 }
  0xdd   :  { %v233_v30 = vmul.f32 %v1672_v13, %v136_v28  ;;  %v243_v28 = vmul.f32 %v1672_v13, %v186_v7 }
  0xde   :  { %1224 = vmatmul.mubr.f32.gmra.mrb[14].mxu0 %v496_v27 }
  0xdf   :  { %v269_v0 = vadd.f32 %v1679_v17, %v233_v30  ;;  %v242_v30 = vmul.f32 %v1672_v13, %v181_v20 }
  0xe1   :  { %v351_v58 = vpop.permute.xlu1 %350  ;;  %v278_v35 = vadd.f32 %v1679_v17, %v242_v30 }
  0xe2   :  { %v433_v33 = vmul.f32 %v1670_v12, %v351_v58  ;;  %v279_v58 = vadd.f32 %v1679_v17, %v243_v28 }
  0xe4   :  { %v465_v37 = vadd.f32 %v433_v33, %v269_v0  ;;  %v443_v33 = vmul.f32 %v1670_v12, %v1664_v10 }
  0xe5   :  { %v355_v38 = vpop.permute.xlu1 %354 }
  0xe6   :  { %v497_v39 = vmax.f32 %v465_v37, 0.0  ;;  %v434_v40 = vmul.f32 %v1670_v12, %v355_v38  ;;  %v475_v38 = vadd.f32 %v443_v33, %v279_v58 }
  0xe8   :  { %v466_v42 = vadd.f32 %v434_v40, %v270_v36  ;;  %1226 = vmatprep.mubr.f32.mxu0 %v497_v39 }
  0xea   :  { %v498_v43 = vmax.f32 %v466_v42, 0.0  ;;  %v151_v44 = vpop.permute.xlu1 %150  ;;  %v507_v42 = vmax.f32 %v475_v38, 0.0 }
  0xeb   :  { %v236_v46 = vmul.f32 %v1672_v13, %v151_v44 }
  0xec   :  { %1227 = vmatmul.mubr.f32.gmra.mrb[16].mxu0 %v498_v43  ;;  %v201_v43 = vpop.permute.xlu0 %200 }
  0xed   :  { %1229 = vmatprep.mubr.f32.mxu0 %v499_v45  ;;  %v272_v49 = vadd.f32 %v1679_v17, %v236_v46 }
  0xef   :  { %v363_v1 = vpop.permute.xlu1 %362 }
  0xf0   :  { %v436_v50 = vmul.f32 %v1670_v12, %v363_v1  ;;  %v206_v1 = vpop.permute.xlu0 %205 }
  0xf2   :  { %v468_v51 = vadd.f32 %v436_v50, %v272_v49 }
  0xf4   :  { %v500_v52 = vmax.f32 %v468_v51, 0.0  ;;  %v156_v53 = vpop.permute.xlu1 %155 }
  0xf5   :  { %v237_v55 = vmul.f32 %v1672_v13, %v156_v53  ;;  %v407_v53 = vpop.permute.xlu0 %406 }
  0xf6   :  { %1230 = vmatmul.mubr.f32.gmra.mrb[18].mxu0 %v500_v52  ;;  %v247_v52 = vmul.f32 %v1672_v13, %v206_v1 }
  0xf7   :  { %v273_v62 = vadd.f32 %v1679_v17, %v237_v55  ;;  %v246_v55 = vmul.f32 %v1672_v13, %v201_v43 }
  0xf8   :  { %v283_v60 = vadd.f32 %v1679_v17, %v247_v52 }
  0xf9   :  { %v367_v59 = vpop.permute.xlu1 %366  ;;  %v282_v3 = vadd.f32 %v1679_v17, %v246_v55 }
  0xfa   :  { %v437_v63 = vmul.f32 %v1670_v12, %v367_v59 }
  0xfc   :  { %v469_v5 = vadd.f32 %v437_v63, %v273_v62  ;;  %v447_v62 = vmul.f32 %v1670_v12, %v407_v53 }
  0xfd   :  { %v371_v48 = vpop.permute.xlu1 %370 }
  0xfe   :  { %v501_v6 = vmax.f32 %v469_v5, 0.0  ;;  %v438_v57 = vmul.f32 %v1670_v12, %v371_v48 }
 0x100   :  { %v470_v4 = vadd.f32 %v438_v57, %v274_v61  ;;  %1232 = vmatprep.mubr.f32.mxu0 %v501_v6  ;;  %v479_v61 = vadd.f32 %v447_v62, %v283_v60 }
 0x102   :  { %v502_v15 = vmax.f32 %v470_v4, 0.0  ;;  %v171_v16 = vpop.permute.xlu1 %170  ;;  %v511_v9 = vmax.f32 %v479_v61, 0.0 }
 0x103   :  { %v240_v19 = vmul.f32 %v1672_v13, %v171_v16 }
 0x104   :  { %1233 = vmatmul.mubr.f32.gmra.mrb[20].mxu0 %v502_v15 }
 0x105   :  { %1235 = vmatprep.mubr.f32.mxu0 %v503_v18  ;;  %v276_v22 = vadd.f32 %v1679_v17, %v240_v19  ;;  %v1844_v19 = vld [vmem:[%s2014_s3 + $0x1] ss:$0 sm:$0xff] }
 0x107   :  { %v379_v21 = vpop.permute.xlu1 %378 }
 0x108   :  { %v440_v23 = vmul.f32 %v1670_v12, %v379_v21 }
 0x10a   :  { %v472_v24 = vadd.f32 %v440_v23, %v276_v22 }
 0x10c   :  { %v504_v25 = vmax.f32 %v472_v24, 0.0  ;;  %v176_v26 = vpop.permute.xlu1 %175 }
 0x10d   :  { %v241_v27 = vmul.f32 %v1672_v13, %v176_v26 }
 0x10e   :  { %1236 = vmatmul.mubr.f32.gmra.mrb[22].mxu0 %v504_v25 }
 0x10f   :  { %v277_v31 = vadd.f32 %v1679_v17, %v241_v27 }
 0x111   :  { %v383_v29 = vpop.permute.xlu1 %382 }
 0x112   :  { %v441_v32 = vmul.f32 %v1670_v12, %v383_v29 }
 0x114   :  { %v473_v0 = vadd.f32 %v441_v32, %v277_v31 }
 0x115   :  { %v387_v34 = vpop.permute.xlu1 %386 }
 0x116   :  { %v505_v36 = vmax.f32 %v473_v0, 0.0  ;;  %v442_v37 = vmul.f32 %v1670_v12, %v387_v34 }
 0x118   :  { %v474_v39 = vadd.f32 %v442_v37, %v278_v35  ;;  %1238 = vmatprep.mubr.f32.mxu0 %v505_v36 }
 0x11a   :  { %v506_v40 = vmax.f32 %v474_v39, 0.0  ;;  %v191_v41 = vpop.permute.xlu1 %190 }
 0x11b   :  { %v244_v44 = vmul.f32 %v1672_v13, %v191_v41 }
 0x11c   :  { %1239 = vmatmul.mubr.f32.gmra.mrb[24].mxu0 %v506_v40 }
 0x11d   :  { %1241 = vmatprep.mubr.f32.mxu0 %v507_v42  ;;  %v280_v10 = vadd.f32 %v1679_v17, %v244_v44 }
 0x11f   :  { %v395_v45 = vpop.permute.xlu1 %394 }
 0x120   :  { %v444_v46 = vmul.f32 %v1670_v12, %v395_v45 }
 0x122   :  { %v476_v47 = vadd.f32 %v444_v46, %v280_v10 }
 0x124   :  { %v508_v49 = vmax.f32 %v476_v47, 0.0  ;;  %v196_v50 = vpop.permute.xlu1 %195 }
 0x125   :  { %v245_v51 = vmul.f32 %v1672_v13, %v196_v50 }
 0x126   :  { %1242 = vmatmul.mubr.f32.gmra.mrb[26].mxu0 %v508_v49 }
 0x127   :  { %v281_v56 = vadd.f32 %v1679_v17, %v245_v51 }
 0x129   :  { %v399_v54 = vpop.permute.xlu1 %398 }
 0x12a   :  { %v445_v59 = vmul.f32 %v1670_v12, %v399_v54 }
 0x12c   :  { %v477_v63 = vadd.f32 %v445_v59, %v281_v56 }
 0x12d   :  { %v403_v2 = vpop.permute.xlu1 %402 }
 0x12e   :  { %v509_v5 = vmax.f32 %v477_v63, 0.0  ;;  %v446_v48 = vmul.f32 %v1670_v12, %v403_v2 }
 0x130   :  { %v478_v6 = vadd.f32 %v446_v48, %v282_v3  ;;  %1244 = vmatprep.mubr.f32.mxu0 %v509_v5 }
 0x132   :  { %v510_v57 = vmax.f32 %v478_v6, 0.0  ;;  %v211_v8 = vpop.permute.xlu1 %210 }
 0x133   :  { %v248_v11 = vmul.f32 %v1672_v13, %v211_v8 }
 0x134   :  { %1245 = vmatmul.mubr.f32.gmra.mrb[28].mxu0 %v510_v57 }
 0x135   :  { %1247 = vmatprep.mubr.f32.mxu0 %v511_v9  ;;  %v284_v4 = vadd.f32 %v1679_v17, %v248_v11 }
 0x137   :  { %v411_v14 = vpop.permute.xlu1 %410 }
 0x138   :  { %v448_v15 = vmul.f32 %v1670_v12, %v411_v14 }
 0x13a   :  { %v480_v16 = vadd.f32 %v448_v15, %v284_v4 }
 0x13c   :  { %v512_v18 = vmax.f32 %v480_v16, 0.0 }
 0x13e   :  { %1248 = vmatmul.mubr.f32.gmra.mrb[30].mxu0 %v512_v18 }
 0x17e   :  { %v1204_v20 = vpop.f32.mrb[0].mxu0 }
 0x17f   :  { %v621_v21 = vadd.f32 %v1204_v20, %v1844_v19  ;;  %v615_v22 = vpop.f32.mrb[1].mxu0 }
 0x180   :  { %v616_v13 = vadd.f32 %v1844_v19, %v615_v22 }
 0x181   :  { %v775_v24 = vmax.f32 %v621_v21, 0.0 }
 0x182   :  { %v774_v23 = vmax.f32 %v616_v13, 0.0 }
 0x183   :  { %v1207_v7 = vpop.f32.mrb[2].mxu0 }
 0x184   :  { %v631_v17 = vadd.f32 %v1207_v7, %v1844_v19  ;;  %v625_v12 = vpop.f32.mrb[3].mxu0  ;;  %1282 = vmatprep.mubr.f32.mxu1 %v774_v23 }
 0x185   :  { %v626_v25 = vadd.f32 %v1844_v19, %v625_v12  ;;  %1283 = vmatmul.mubr.f32.vlgmr.msra.gmra.mrb[0].mxu1 %v775_v24 }
 0x186   :  { %v777_v28 = vmax.f32 %v631_v17, 0.0 }
 0x187   :  { %v776_v26 = vmax.f32 %v626_v25, 0.0  ;;  %v1210_v27 = vpop.f32.mrb[4].mxu0 }
 0x188   :  { %v641_v29 = vadd.f32 %v1210_v27, %v1844_v19  ;;  %v635_v30 = vpop.f32.mrb[5].mxu0 }
 0x189   :  { %v636_v31 = vadd.f32 %v1844_v19, %v635_v30  ;;  %1285 = vmatprep.mubr.f32.mxu1 %v776_v26 }
 0x18a   :  { %1286 = vmatmul.mubr.f32.gmra.mrb[2].mxu1 %v777_v28  ;;  %v779_v0 = vmax.f32 %v641_v29, 0.0 }
 0x18b   :  { %v778_v32 = vmax.f32 %v636_v31, 0.0  ;;  %v1213_v58 = vpop.f32.mrb[6].mxu0 }
 0x18c   :  { %v651_v33 = vadd.f32 %v1213_v58, %v1844_v19  ;;  %v645_v34 = vpop.f32.mrb[7].mxu0 }
 0x18d   :  { %v646_v35 = vadd.f32 %v1844_v19, %v645_v34  ;;  %1288 = vmatprep.mubr.f32.mxu1 %v778_v32 }
 0x18e   :  { %1289 = vmatmul.mubr.f32.gmra.mrb[4].mxu1 %v779_v0  ;;  %v781_v38 = vmax.f32 %v651_v33, 0.0 }
 0x18f   :  { %v780_v36 = vmax.f32 %v646_v35, 0.0  ;;  %v1216_v37 = vpop.f32.mrb[8].mxu0 }
 0x190   :  { %v661_v39 = vadd.f32 %v1216_v37, %v1844_v19  ;;  %v655_v40 = vpop.f32.mrb[9].mxu0 }
 0x191   :  { %v656_v41 = vadd.f32 %v1844_v19, %v655_v40  ;;  %1291 = vmatprep.mubr.f32.mxu1 %v780_v36 }
 0x192   :  { %1292 = vmatmul.mubr.f32.gmra.mrb[6].mxu1 %v781_v38  ;;  %v783_v43 = vmax.f32 %v661_v39, 0.0 }
 0x193   :  { %v782_v42 = vmax.f32 %v656_v41, 0.0 }
 0x195   :  { %1294 = vmatprep.mubr.f32.mxu1 %v782_v42 }
 0x196   :  { %1295 = vmatmul.mubr.f32.gmra.mrb[8].mxu1 %v783_v43 }
 0x199   :  { %v1219_v44 = vpop.f32.mrb[10].mxu0 }
 0x19a   :  { %v671_v45 = vadd.f32 %v1219_v44, %v1844_v19  ;;  %v665_v10 = vpop.f32.mrb[11].mxu0 }
 0x19b   :  { %v666_v46 = vadd.f32 %v1844_v19, %v665_v10 }
 0x19c   :  { %v785_v47 = vmax.f32 %v671_v45, 0.0 }
 0x19d   :  { %v784_v1 = vmax.f32 %v666_v46, 0.0  ;;  %v1881_v46 = vld [vmem:[%s2014_s3 + $0x2] ss:$0 sm:$0xff] }
 0x19f   :  { %1297 = vmatprep.mubr.f32.mxu1 %v784_v1 }
 0x1a0   :  { %1298 = vmatmul.mubr.f32.gmra.mrb[10].mxu1 %v785_v47 }
 0x1a7   :  { %v1222_v49 = vpop.f32.mrb[12].mxu0 }
 0x1a8   :  { %v681_v50 = vadd.f32 %v1222_v49, %v1844_v19  ;;  %v675_v51 = vpop.f32.mrb[13].mxu0 }
 0x1a9   :  { %v676_v52 = vadd.f32 %v1844_v19, %v675_v51 }
 0x1aa   :  { %v787_v54 = vmax.f32 %v681_v50, 0.0 }
 0x1ab   :  { %v786_v53 = vmax.f32 %v676_v52, 0.0 }
 0x1ad   :  { %1300 = vmatprep.mubr.f32.mxu1 %v786_v53 }
 0x1ae   :  { %1301 = vmatmul.mubr.f32.gmra.mrb[12].mxu1 %v787_v54 }
 0x1b1   :  { %v1225_v55 = vpop.f32.mrb[14].mxu0 }
 0x1b2   :  { %v691_v56 = vadd.f32 %v1225_v55, %v1844_v19  ;;  %v685_v59 = vpop.f32.mrb[15].mxu0 }
 0x1b3   :  { %v686_v60 = vadd.f32 %v1844_v19, %v685_v59 }
 0x1b4   :  { %v789_v63 = vmax.f32 %v691_v56, 0.0 }
 0x1b5   :  { %v788_v62 = vmax.f32 %v686_v60, 0.0 }
 0x1b7   :  { %1303 = vmatprep.mubr.f32.mxu1 %v788_v62 }
 0x1b8   :  { %1304 = vmatmul.mubr.f32.gmra.mrb[14].mxu1 %v789_v63 }
 0x1bf   :  { %v1228_v2 = vpop.f32.mrb[16].mxu0 }
 0x1c0   :  { %v701_v3 = vadd.f32 %v1228_v2, %v1844_v19  ;;  %v695_v5 = vpop.f32.mrb[17].mxu0 }
 0x1c1   :  { %v696_v48 = vadd.f32 %v1844_v19, %v695_v5 }
 0x1c2   :  { %v791_v6 = vmax.f32 %v701_v3, 0.0 }
 0x1c3   :  { %v790_v61 = vmax.f32 %v696_v48, 0.0 }
 0x1c5   :  { %1306 = vmatprep.mubr.f32.mxu1 %v790_v61 }
 0x1c6   :  { %1307 = vmatmul.mubr.f32.gmra.mrb[16].mxu1 %v791_v6 }
 0x1c9   :  { %v1231_v57 = vpop.f32.mrb[18].mxu0 }
 0x1ca   :  { %v711_v8 = vadd.f32 %v1231_v57, %v1844_v19  ;;  %v705_v9 = vpop.f32.mrb[19].mxu0 }
 0x1cb   :  { %v706_v11 = vadd.f32 %v1844_v19, %v705_v9 }
 0x1cc   :  { %v793_v4 = vmax.f32 %v711_v8, 0.0 }
 0x1cd   :  { %v792_v14 = vmax.f32 %v706_v11, 0.0 }
 0x1cf   :  { %1309 = vmatprep.mubr.f32.mxu1 %v792_v14 }
 0x1d0   :  { %1310 = vmatmul.mubr.f32.gmra.mrb[18].mxu1 %v793_v4 }
 0x1d7   :  { %v1234_v15 = vpop.f32.mrb[20].mxu0 }
 0x1d8   :  { %v721_v16 = vadd.f32 %v1234_v15, %v1844_v19  ;;  %v715_v18 = vpop.f32.mrb[21].mxu0 }
 0x1d9   :  { %v716_v20 = vadd.f32 %v1844_v19, %v715_v18 }
 0x1da   :  { %v795_v22 = vmax.f32 %v721_v16, 0.0 }
 0x1db   :  { %v794_v21 = vmax.f32 %v716_v20, 0.0 }
 0x1dd   :  { %1312 = vmatprep.mubr.f32.mxu1 %v794_v21 }
 0x1de   :  { %1313 = vmatmul.mubr.f32.gmra.mrb[20].mxu1 %v795_v22 }
 0x1e1   :  { %v1237_v13 = vpop.f32.mrb[22].mxu0 }
 0x1e2   :  { %v731_v23 = vadd.f32 %v1237_v13, %v1844_v19  ;;  %v725_v24 = vpop.f32.mrb[23].mxu0 }
 0x1e3   :  { %v726_v7 = vadd.f32 %v1844_v19, %v725_v24 }
 0x1e4   :  { %v797_v12 = vmax.f32 %v731_v23, 0.0 }
 0x1e5   :  { %v796_v17 = vmax.f32 %v726_v7, 0.0 }
 0x1e7   :  { %1315 = vmatprep.mubr.f32.mxu1 %v796_v17 }
 0x1e8   :  { %1316 = vmatmul.mubr.f32.gmra.mrb[22].mxu1 %v797_v12 }
 0x1ef   :  { %v1240_v25 = vpop.f32.mrb[24].mxu0 }
 0x1f0   :  { %v741_v26 = vadd.f32 %v1240_v25, %v1844_v19  ;;  %v735_v27 = vpop.f32.mrb[25].mxu0 }
 0x1f1   :  { %v736_v28 = vadd.f32 %v1844_v19, %v735_v27 }
 0x1f2   :  { %v799_v30 = vmax.f32 %v741_v26, 0.0 }
 0x1f3   :  { %v798_v29 = vmax.f32 %v736_v28, 0.0 }
 0x1f5   :  { %1318 = vmatprep.mubr.f32.mxu1 %v798_v29 }
 0x1f6   :  { %1319 = vmatmul.mubr.f32.gmra.mrb[24].mxu1 %v799_v30 }
 0x1f9   :  { %v1243_v31 = vpop.f32.mrb[26].mxu0 }
 0x1fa   :  { %v751_v32 = vadd.f32 %v1243_v31, %v1844_v19  ;;  %v745_v58 = vpop.f32.mrb[27].mxu0 }
 0x1fb   :  { %v746_v0 = vadd.f32 %v1844_v19, %v745_v58 }
 0x1fc   :  { %v801_v34 = vmax.f32 %v751_v32, 0.0 }
 0x1fd   :  { %v800_v33 = vmax.f32 %v746_v0, 0.0 }
 0x1ff   :  { %1321 = vmatprep.mubr.f32.mxu1 %v800_v33 }
 0x200   :  { %1322 = vmatmul.mubr.f32.gmra.mrb[26].mxu1 %v801_v34 }
 0x207   :  { %v1246_v35 = vpop.f32.mrb[28].mxu0 }
 0x208   :  { %v761_v36 = vadd.f32 %v1246_v35, %v1844_v19  ;;  %v755_v37 = vpop.f32.mrb[29].mxu0 }
 0x209   :  { %v756_v38 = vadd.f32 %v1844_v19, %v755_v37 }
 0x20a   :  { %v803_v40 = vmax.f32 %v761_v36, 0.0 }
 0x20b   :  { %v802_v39 = vmax.f32 %v756_v38, 0.0 }
 0x20d   :  { %1324 = vmatprep.mubr.f32.mxu1 %v802_v39 }
 0x20e   :  { %1325 = vmatmul.mubr.f32.gmra.mrb[28].mxu1 %v803_v40 }
 0x211   :  { %v1249_v41 = vpop.f32.mrb[30].mxu0 }
 0x212   :  { %v771_v42 = vadd.f32 %v1249_v41, %v1844_v19  ;;  %v765_v43 = vpop.f32.mrb[31].mxu0 }
 0x213   :  { %v766_v44 = vadd.f32 %v1844_v19, %v765_v43 }
 0x214   :  { %v805_v10 = vmax.f32 %v771_v42, 0.0 }
 0x215   :  { %v804_v45 = vmax.f32 %v766_v44, 0.0 }
 0x217   :  { %1327 = vmatprep.mubr.f32.mxu1 %v804_v45 }
 0x218   :  { %1328 = vmatmul.mubr.f32.gmra.mrb[30].mxu1 %v805_v10 }
 0x258   :  { %v1284_v1 = vpop.f32.mrb[0].mxu1 }
 0x259   :  { %v882_v47 = vadd.f32 %v1284_v1, %v1881_v46  ;;  %v876_v49 = vpop.f32.mrb[1].mxu1 }
 0x25a   :  { %v877_v50 = vadd.f32 %v1881_v46, %v876_v49 }
 0x25b   :  { %1036 = vst [vmem:[%s2015_s4 + $0x8] sm:$0xff] %v882_v47 }
 0x25c   :  { %1035 = vst [vmem:[%s2015_s4] sm:$0xff] %v877_v50 }
 0x25d   :  { %v1287_v19 = vpop.f32.mrb[2].mxu1 }
 0x25e   :  { %v892_v51 = vadd.f32 %v1287_v19, %v1881_v46  ;;  %v886_v52 = vpop.f32.mrb[3].mxu1 }
 0x25f   :  { %v887_v53 = vadd.f32 %v1881_v46, %v886_v52 }
 0x260   :  { %1038 = vst [vmem:[%s2015_s4 + $0x18] sm:$0xff] %v892_v51 }
 0x261   :  { %1037 = vst [vmem:[%s2015_s4 + $0x10] sm:$0xff] %v887_v53  ;;  %v1290_v54 = vpop.f32.mrb[4].mxu1 }
 0x262   :  { %v902_v55 = vadd.f32 %v1290_v54, %v1881_v46  ;;  %v896_v56 = vpop.f32.mrb[5].mxu1 }
 0x263   :  { %v897_v59 = vadd.f32 %v1881_v46, %v896_v56 }
 0x264   :  { %1040 = vst [vmem:[%s2015_s4 + $0x28] sm:$0xff] %v902_v55 }
 0x265   :  { %1039 = vst [vmem:[%s2015_s4 + $0x20] sm:$0xff] %v897_v59  ;;  %v1293_v60 = vpop.f32.mrb[6].mxu1 }
 0x266   :  { %v912_v62 = vadd.f32 %v1293_v60, %v1881_v46  ;;  %v906_v63 = vpop.f32.mrb[7].mxu1 }
 0x267   :  { %v907_v2 = vadd.f32 %v1881_v46, %v906_v63 }
 0x268   :  { %1042 = vst [vmem:[%s2015_s4 + $0x38] sm:$0xff] %v912_v62 }
 0x269   :  { %1041 = vst [vmem:[%s2015_s4 + $0x30] sm:$0xff] %v907_v2  ;;  %v1296_v3 = vpop.f32.mrb[8].mxu1 }
 0x26a   :  { %v922_v5 = vadd.f32 %v1296_v3, %v1881_v46  ;;  %v916_v48 = vpop.f32.mrb[9].mxu1 }
 0x26b   :  { %v917_v61 = vadd.f32 %v1881_v46, %v916_v48 }
 0x26c   :  { %1044 = vst [vmem:[%s2015_s4 + $0x48] sm:$0xff] %v922_v5 }
 0x26d   :  { %1043 = vst [vmem:[%s2015_s4 + $0x40] sm:$0xff] %v917_v61 }
 0x273   :  { %v1299_v6 = vpop.f32.mrb[10].mxu1 }
 0x274   :  { %v932_v57 = vadd.f32 %v1299_v6, %v1881_v46  ;;  %v926_v8 = vpop.f32.mrb[11].mxu1 }
 0x275   :  { %v927_v9 = vadd.f32 %v1881_v46, %v926_v8 }
 0x276   :  { %1046 = vst [vmem:[%s2015_s4 + $0x58] sm:$0xff] %v932_v57 }
 0x277   :  { %1045 = vst [vmem:[%s2015_s4 + $0x50] sm:$0xff] %v927_v9 }
 0x281   :  { %v1302_v11 = vpop.f32.mrb[12].mxu1 }
 0x282   :  { %v942_v14 = vadd.f32 %v1302_v11, %v1881_v46  ;;  %v936_v4 = vpop.f32.mrb[13].mxu1 }
 0x283   :  { %v937_v15 = vadd.f32 %v1881_v46, %v936_v4 }
 0x284   :  { %1048 = vst [vmem:[%s2015_s4 + $0x68] sm:$0xff] %v942_v14 }
 0x285   :  { %1047 = vst [vmem:[%s2015_s4 + $0x60] sm:$0xff] %v937_v15 }
 0x28b   :  { %v1305_v16 = vpop.f32.mrb[14].mxu1 }
 0x28c   :  { %v952_v18 = vadd.f32 %v1305_v16, %v1881_v46  ;;  %v946_v20 = vpop.f32.mrb[15].mxu1 }
 0x28d   :  { %v947_v21 = vadd.f32 %v1881_v46, %v946_v20 }
 0x28e   :  { %1050 = vst [vmem:[%s2015_s4 + $0x78] sm:$0xff] %v952_v18 }
 0x28f   :  { %1049 = vst [vmem:[%s2015_s4 + $0x70] sm:$0xff] %v947_v21 }
 0x299   :  { %v1308_v22 = vpop.f32.mrb[16].mxu1 }
 0x29a   :  { %v962_v13 = vadd.f32 %v1308_v22, %v1881_v46  ;;  %v956_v23 = vpop.f32.mrb[17].mxu1 }
 0x29b   :  { %v957_v24 = vadd.f32 %v1881_v46, %v956_v23 }
 0x29c   :  { %1052 = vst [vmem:[%s2015_s4 + $0x88] sm:$0xff] %v962_v13 }
 0x29d   :  { %1051 = vst [vmem:[%s2015_s4 + $0x80] sm:$0xff] %v957_v24 }
 0x2a3   :  { %v1311_v7 = vpop.f32.mrb[18].mxu1 }
 0x2a4   :  { %v972_v17 = vadd.f32 %v1311_v7, %v1881_v46  ;;  %v966_v12 = vpop.f32.mrb[19].mxu1 }
 0x2a5   :  { %v967_v25 = vadd.f32 %v1881_v46, %v966_v12 }
 0x2a6   :  { %1054 = vst [vmem:[%s2015_s4 + $0x98] sm:$0xff] %v972_v17 }
 0x2a7   :  { %1053 = vst [vmem:[%s2015_s4 + $0x90] sm:$0xff] %v967_v25 }
 0x2b1   :  { %v1314_v26 = vpop.f32.mrb[20].mxu1 }
 0x2b2   :  { %v982_v27 = vadd.f32 %v1314_v26, %v1881_v46  ;;  %v976_v28 = vpop.f32.mrb[21].mxu1 }
 0x2b3   :  { %v977_v29 = vadd.f32 %v1881_v46, %v976_v28 }
 0x2b4   :  { %1056 = vst [vmem:[%s2015_s4 + $0xa8] sm:$0xff] %v982_v27 }
 0x2b5   :  { %1055 = vst [vmem:[%s2015_s4 + $0xa0] sm:$0xff] %v977_v29 }
 0x2bb   :  { %v1317_v30 = vpop.f32.mrb[22].mxu1 }
 0x2bc   :  { %v992_v31 = vadd.f32 %v1317_v30, %v1881_v46  ;;  %v986_v32 = vpop.f32.mrb[23].mxu1 }
 0x2bd   :  { %v987_v58 = vadd.f32 %v1881_v46, %v986_v32 }
 0x2be   :  { %1058 = vst [vmem:[%s2015_s4 + $0xb8] sm:$0xff] %v992_v31 }
 0x2bf   :  { %1057 = vst [vmem:[%s2015_s4 + $0xb0] sm:$0xff] %v987_v58 }
 0x2c9   :  { %v1320_v0 = vpop.f32.mrb[24].mxu1 }
 0x2ca   :  { %v1002_v33 = vadd.f32 %v1320_v0, %v1881_v46  ;;  %v996_v34 = vpop.f32.mrb[25].mxu1 }
 0x2cb   :  { %v997_v35 = vadd.f32 %v1881_v46, %v996_v34 }
 0x2cc   :  { %1060 = vst [vmem:[%s2015_s4 + $0xc8] sm:$0xff] %v1002_v33 }
 0x2cd   :  { %1059 = vst [vmem:[%s2015_s4 + $0xc0] sm:$0xff] %v997_v35 }
 0x2d3   :  { %v1323_v36 = vpop.f32.mrb[26].mxu1 }
 0x2d4   :  { %v1012_v37 = vadd.f32 %v1323_v36, %v1881_v46  ;;  %v1006_v38 = vpop.f32.mrb[27].mxu1 }
 0x2d5   :  { %v1007_v39 = vadd.f32 %v1881_v46, %v1006_v38 }
 0x2d6   :  { %1062 = vst [vmem:[%s2015_s4 + $0xd8] sm:$0xff] %v1012_v37 }
 0x2d7   :  { %1061 = vst [vmem:[%s2015_s4 + $0xd0] sm:$0xff] %v1007_v39 }
 0x2e1   :  { %v1326_v40 = vpop.f32.mrb[28].mxu1 }
 0x2e2   :  { %v1022_v41 = vadd.f32 %v1326_v40, %v1881_v46  ;;  %v1016_v42 = vpop.f32.mrb[29].mxu1 }
 0x2e3   :  { %v1017_v43 = vadd.f32 %v1881_v46, %v1016_v42 }
 0x2e4   :  { %1064 = vst [vmem:[%s2015_s4 + $0xe8] sm:$0xff] %v1022_v41 }
 0x2e5   :  { %1063 = vst [vmem:[%s2015_s4 + $0xe0] sm:$0xff] %v1017_v43 }
 0x2eb   :  { %v1329_v44 = vpop.f32.mrb[30].mxu1 }
 0x2ec   :  { %v1032_v45 = vadd.f32 %v1329_v44, %v1881_v46  ;;  %v1026_v10 = vpop.f32.mrb[31].mxu1 }
 0x2ed   :  { %v1027_v1 = vadd.f32 %v1881_v46, %v1026_v10 }
 0x2ee   :  { %1066 = vst [vmem:[%s2015_s4 + $0xf8] sm:$0xff] %v1032_v45 }
 0x2ef   :  { %1065 = vst [vmem:[%s2015_s4 + $0xf0] sm:$0xff] %v1027_v1 }

</bundles_post_ra>
